<compile_context>
chip_gen: v6e
topology: v6e:2x2x1
jax: 0.10.0
libtpu: 0.0.40
codegen_flags: <defaults>
</compile_context>

<pallas_src>
import jax
import jax.numpy as jnp
from jax.experimental import pallas as pl
from jax.experimental.pallas import tpu as pltpu

HIDDEN_SIZES = (400, 300)   # fixed by CtsPolicyLarger


def _round_up(n, m):
    return ((n + m - 1) // m) * m


def _pad2d(a, rows, cols):
    return jnp.pad(a, ((0, rows - a.shape[0]), (0, cols - a.shape[1])))


def _cts_policy_larger_kernel(x_ref, w1_ref, b1_ref, w2_ref, b2_ref,
                              w3_ref, b3_ref, mean_ref):
    x = x_ref[...]

    h1 = jnp.dot(x, w1_ref[...], preferred_element_type=jnp.float32) + b1_ref[...]
    h1 = jnp.maximum(h1, 0.0)                                   # ReLU (activation='relu')

    h2 = jnp.dot(h1, w2_ref[...], preferred_element_type=jnp.float32) + b2_ref[...]
    h2 = jnp.maximum(h2, 0.0)                                   # ReLU

    m = jnp.dot(h2, w3_ref[...], preferred_element_type=jnp.float32) + b3_ref[...]
    mean_ref[...] = jnp.tanh(m).astype(mean_ref.dtype)          # CtsPolicyLarger: tanh(mean)


def cts_policy_larger_forward(x, params):
    """x: (B, state_dim) f32.  Weights stored as (in, out) [nn.Linear transposed].
    Returns (tanh(mean) with shape (B, action_dim), std with shape (action_dim,))."""
    B, S = x.shape
    H1 = params["w1"].shape[1]
    H2 = params["w2"].shape[1]
    A = params["w3"].shape[1]

    # Lane-dense padded feature sizes (multiples of 128).
    S_p = _round_up(S, 128)
    H1_p = _round_up(H1, 128)      # 400 -> 512
    H2_p = _round_up(H2, 128)      # 300 -> 384
    A_p = _round_up(A, 128)

    # Batch: pad to sublane multiple of 8, tile over a grid (TB rows per step).
    B_pad = _round_up(max(B, 1), 8)
    TB = min(B_pad, 256)
    B_pad = _round_up(B_pad, TB)
    grid = (B_pad // TB,)

    x_p = _pad2d(x, B_pad, S_p)
    w1 = _pad2d(params["w1"], S_p, H1_p)
    b1 = _pad2d(params["b1"].reshape(1, -1), 1, H1_p)
    w2 = _pad2d(params["w2"], H1_p, H2_p)
    b2 = _pad2d(params["b2"].reshape(1, -1), 1, H2_p)
    w3 = _pad2d(params["w3"], H2_p, A_p)
    b3 = _pad2d(params["b3"].reshape(1, -1), 1, A_p)

    flops = 2 * B_pad * (S_p * H1_p + H1_p * H2_p + H2_p * A_p)
    bytes_accessed = 4 * (B_pad * S_p + S_p * H1_p + H1_p + H1_p * H2_p + H2_p
                          + H2_p * A_p + A_p + B_pad * A_p)

    mean_p = pl.pallas_call(
        _cts_policy_larger_kernel,
        out_shape=jax.ShapeDtypeStruct((B_pad, A_p), jnp.float32),
        grid=grid,
        in_specs=[
            pl.BlockSpec((TB, S_p), lambda i: (i, 0)),       # x streams over batch
            pl.BlockSpec((S_p, H1_p), lambda i: (0, 0)),     # weights stay resident
            pl.BlockSpec((1, H1_p), lambda i: (0, 0)),
            pl.BlockSpec((H1_p, H2_p), lambda i: (0, 0)),
            pl.BlockSpec((1, H2_p), lambda i: (0, 0)),
            pl.BlockSpec((H2_p, A_p), lambda i: (0, 0)),
            pl.BlockSpec((1, A_p), lambda i: (0, 0)),
        ],
        out_specs=pl.BlockSpec((TB, A_p), lambda i: (i, 0)),
        compiler_params=pltpu.CompilerParams(
            dimension_semantics=("parallel",)),              # v7x: shard batch over 2 TCs
        cost_estimate=pl.CostEstimate(
            flops=flops,
            transcendentals=B_pad * A_p,
            bytes_accessed=bytes_accessed),
    )(x_p, w1, b1, w2, b2, w3, b3)

    mean = mean_p[:B, :A]
    std = jnp.exp(params["log_stdev"])   # x-independent -> computed outside the kernel
    return mean, std


def init_params(key, state_dim, action_dim, hidden_sizes=HIDDEN_SIZES):
    """Xavier-uniform-like weights, zero biases / log_stdev — mirrors
    initialize_weights(mod, 'xavier') (matrices xavier, vectors zeroed)."""
    def xavier(k, fan_in, fan_out):
        limit = (6.0 / (fan_in + fan_out)) ** 0.5
        return jax.random.uniform(k, (fan_in, fan_out), jnp.float32, -limit, limit)

    h1, h2 = hidden_sizes
    k1, k2, k3 = jax.random.split(key, 3)
    return {
        "w1": xavier(k1, state_dim, h1),
        "b1": jnp.zeros((h1,), jnp.float32),
        "w2": xavier(k2, h1, h2),
        "b2": jnp.zeros((h2,), jnp.float32),
        "w3": xavier(k3, h2, action_dim),
        "b3": jnp.zeros((action_dim,), jnp.float32),
        "log_stdev": jnp.zeros((action_dim,), jnp.float32),
    }


def reference_forward(x, p):
    h1 = jnp.maximum(x @ p["w1"] + p["b1"], 0.0)
    h2 = jnp.maximum(h1 @ p["w2"] + p["b2"], 0.0)
    m = h2 @ p["w3"] + p["b3"]
    return jnp.tanh(m), jnp.exp(p["log_stdev"])


if __name__ == "__main__":
    key = jax.random.PRNGKey(0)
    k_param, k_x = jax.random.split(key)

    batch, state_dim, action_dim = 2, 17, 6
    params = init_params(k_param, state_dim, action_dim)
    x = jax.random.normal(k_x, (batch, state_dim), jnp.float32)

    mean, std = cts_policy_larger_forward(x, params)
    mean, std = jax.block_until_ready((mean, std))

    mean_ref, std_ref = reference_forward(x, params)
    assert mean.shape == (batch, action_dim)
    assert std.shape == (action_dim,)
    assert jnp.allclose(mean, mean_ref, atol=1e-5, rtol=1e-5)
    assert jnp.allclose(std, std_ref, atol=1e-6, rtol=1e-6)

    print("KERNEL_OK")
</pallas_src>

<mosaic_0001>
module attributes {stable_mosaic.version = 11 : i64} {
  func.func @_cts_policy_larger_kernel(%arg0: i32, %arg1: memref<8x128xf32, #tpu.memory_space<vmem>>, %arg2: memref<128x512xf32, #tpu.memory_space<vmem>>, %arg3: memref<1x512xf32, #tpu.memory_space<vmem>>, %arg4: memref<512x384xf32, #tpu.memory_space<vmem>>, %arg5: memref<1x384xf32, #tpu.memory_space<vmem>>, %arg6: memref<384x128xf32, #tpu.memory_space<vmem>>, %arg7: memref<1x128xf32, #tpu.memory_space<vmem>>, %arg8: memref<8x128xf32, #tpu.memory_space<vmem>>) attributes {dimension_semantics = [#tpu.dimension_semantics<parallel>], iteration_bounds = array<i64: 1>, scalar_prefetch = 0 : i64, scratch_operands = 0 : i64, tpu.core_type = #tpu.core_type<tc>, window_params = [{transform_indices = @transform_0, window_bounds = array<i64: 8, 128>}, {pipeline_mode = #tpu.pipeline_mode<synchronous>, transform_indices = @transform_1, window_bounds = array<i64: 128, 512>}, {pipeline_mode = #tpu.pipeline_mode<synchronous>, transform_indices = @transform_2, window_bounds = array<i64: 1, 512>}, {pipeline_mode = #tpu.pipeline_mode<synchronous>, transform_indices = @transform_3, window_bounds = array<i64: 512, 384>}, {pipeline_mode = #tpu.pipeline_mode<synchronous>, transform_indices = @transform_4, window_bounds = array<i64: 1, 384>}, {pipeline_mode = #tpu.pipeline_mode<synchronous>, transform_indices = @transform_5, window_bounds = array<i64: 384, 128>}, {pipeline_mode = #tpu.pipeline_mode<synchronous>, transform_indices = @transform_6, window_bounds = array<i64: 1, 128>}, {transform_indices = @transform_7, window_bounds = array<i64: 8, 128>}]} {
    %c0 = arith.constant 0 : index
    %c0_0 = arith.constant 0 : index
    %0 = vector.load %arg1[%c0, %c0_0] : memref<8x128xf32, #tpu.memory_space<vmem>>, vector<8x128xf32>
    %c0_1 = arith.constant 0 : index
    %c0_2 = arith.constant 0 : index
    %1 = vector.load %arg2[%c0_1, %c0_2] : memref<128x512xf32, #tpu.memory_space<vmem>>, vector<128x512xf32>
    %cst = arith.constant dense<0.000000e+00> : vector<8x512xf32>
    %2 = tpu.matmul %0, %1, %cst {dimension_numbers = #tpu.dot_dimension_numbers<[1], [0], [0], [1], [0, 0, 1, 1], [], []>} : vector<8x128xf32>, vector<128x512xf32>, vector<8x512xf32> -> vector<8x512xf32>
    %c0_3 = arith.constant 0 : index
    %c0_4 = arith.constant 0 : index
    %3 = vector.load %arg3[%c0_3, %c0_4] : memref<1x512xf32, #tpu.memory_space<vmem>>, vector<1x512xf32>
    %4 = vector.broadcast %3 : vector<1x512xf32> to vector<8x512xf32>
    %5 = arith.addf %2, %4 : vector<8x512xf32>
    %cst_5 = arith.constant 0.000000e+00 : f32
    %6 = vector.broadcast %cst_5 : f32 to vector<8x512xf32>
    %7 = arith.maximumf %5, %6 : vector<8x512xf32>
    %c0_6 = arith.constant 0 : index
    %c0_7 = arith.constant 0 : index
    %8 = vector.load %arg4[%c0_6, %c0_7] : memref<512x384xf32, #tpu.memory_space<vmem>>, vector<512x384xf32>
    %cst_8 = arith.constant dense<0.000000e+00> : vector<8x384xf32>
    %9 = tpu.matmul %7, %8, %cst_8 {dimension_numbers = #tpu.dot_dimension_numbers<[1], [0], [0], [1], [0, 0, 1, 1], [], []>} : vector<8x512xf32>, vector<512x384xf32>, vector<8x384xf32> -> vector<8x384xf32>
    %c0_9 = arith.constant 0 : index
    %c0_10 = arith.constant 0 : index
    %10 = vector.load %arg5[%c0_9, %c0_10] : memref<1x384xf32, #tpu.memory_space<vmem>>, vector<1x384xf32>
    %11 = vector.broadcast %10 : vector<1x384xf32> to vector<8x384xf32>
    %12 = arith.addf %9, %11 : vector<8x384xf32>
    %cst_11 = arith.constant 0.000000e+00 : f32
    %13 = vector.broadcast %cst_11 : f32 to vector<8x384xf32>
    %14 = arith.maximumf %12, %13 : vector<8x384xf32>
    %c0_12 = arith.constant 0 : index
    %c0_13 = arith.constant 0 : index
    %15 = vector.load %arg6[%c0_12, %c0_13] : memref<384x128xf32, #tpu.memory_space<vmem>>, vector<384x128xf32>
    %cst_14 = arith.constant dense<0.000000e+00> : vector<8x128xf32>
    %16 = tpu.matmul %14, %15, %cst_14 {dimension_numbers = #tpu.dot_dimension_numbers<[1], [0], [0], [1], [0, 0, 1, 1], [], []>} : vector<8x384xf32>, vector<384x128xf32>, vector<8x128xf32> -> vector<8x128xf32>
    %c0_15 = arith.constant 0 : index
    %c0_16 = arith.constant 0 : index
    %17 = vector.load %arg7[%c0_15, %c0_16] : memref<1x128xf32, #tpu.memory_space<vmem>>, vector<1x128xf32>
    %18 = vector.broadcast %17 : vector<1x128xf32> to vector<8x128xf32>
    %19 = arith.addf %16, %18 : vector<8x128xf32>
    %20 = math.tanh %19 : vector<8x128xf32>
    %c0_17 = arith.constant 0 : index
    %c0_18 = arith.constant 0 : index
    %21 = vector.load %arg8[%c0_17, %c0_18] : memref<8x128xf32, #tpu.memory_space<vmem>>, vector<8x128xf32>
    tpu.vector_store %arg8[%c0_17, %c0_18], %20 {strides = array<i32>} : memref<8x128xf32, #tpu.memory_space<vmem>>, vector<8x128xf32>,
    return
  }
  func.func @transform_0(%arg0: i32) -> (i32, i32) {
    %c0_i32 = arith.constant 0 : i32
    %c0_i32_0 = arith.constant 0 : i32
    return %arg0, %c0_i32 : i32, i32
  }
  func.func @transform_1(%arg0: i32) -> (i32, i32) {
    %c0_i32 = arith.constant 0 : i32
    %c0_i32_0 = arith.constant 0 : i32
    %c0_i32_1 = arith.constant 0 : i32
    return %c0_i32, %c0_i32_0 : i32, i32
  }
  func.func @transform_2(%arg0: i32) -> (i32, i32) {
    %c0_i32 = arith.constant 0 : i32
    %c0_i32_0 = arith.constant 0 : i32
    %c0_i32_1 = arith.constant 0 : i32
    return %c0_i32, %c0_i32_0 : i32, i32
  }
  func.func @transform_3(%arg0: i32) -> (i32, i32) {
    %c0_i32 = arith.constant 0 : i32
    %c0_i32_0 = arith.constant 0 : i32
    %c0_i32_1 = arith.constant 0 : i32
    return %c0_i32, %c0_i32_0 : i32, i32
  }
  func.func @transform_4(%arg0: i32) -> (i32, i32) {
    %c0_i32 = arith.constant 0 : i32
    %c0_i32_0 = arith.constant 0 : i32
    %c0_i32_1 = arith.constant 0 : i32
    return %c0_i32, %c0_i32_0 : i32, i32
  }
  func.func @transform_5(%arg0: i32) -> (i32, i32) {
    %c0_i32 = arith.constant 0 : i32
    %c0_i32_0 = arith.constant 0 : i32
    %c0_i32_1 = arith.constant 0 : i32
    return %c0_i32, %c0_i32_0 : i32, i32
  }
  func.func @transform_6(%arg0: i32) -> (i32, i32) {
    %c0_i32 = arith.constant 0 : i32
    %c0_i32_0 = arith.constant 0 : i32
    %c0_i32_1 = arith.constant 0 : i32
    return %c0_i32, %c0_i32_0 : i32, i32
  }
  func.func @transform_7(%arg0: i32) -> (i32, i32) {
    %c0_i32 = arith.constant 0 : i32
    %c0_i32_0 = arith.constant 0 : i32
    return %arg0, %c0_i32 : i32, i32
  }
}

</mosaic_0001>

<bundles_post_ra>
// kernel: tpu_custom_call.1
= control target key start
LH: loop header
LB: loop body
LE: loop exit
PB: predicated region body
PF: predicated region fallthrough
CT: control target
= control target key end

     0   :  { %12 = vsyncpa [#allocation3], 0  ;;  %s1463_s0 = inlined_call_operand.hbm [shape: f32[8,128], index: 0, kind: input, shape index: {}]   ;;  %s1464_s1 = inlined_call_operand.hbm [shape: f32[128,512], index: 1, kind: input, shape index: {}]   ;;  %s1465_s2 = inlined_call_operand.hbm [shape: f32[1,512], index: 2, kind: input, shape index: {}]   ;;  %s1466_s3 = inlined_call_operand.hbm [shape: f32[512,384], index: 3, kind: input, shape index: {}]   ;;  %s1467_s4 = inlined_call_operand.vmem [shape: f32[1,384], index: 4, kind: input, shape index: {}]   ;;  %s1468_s5 = inlined_call_operand.hbm [shape: f32[384,128], index: 5, kind: input, shape index: {}]   ;;  %s1469_s6 = inlined_call_operand.vmem [shape: f32[1,128], index: 6, kind: input, shape index: {}]   ;;  %s1470_s7 = inlined_call_operand.hbm [shape: f32[8,128], index: 7, kind: output, shape index: {}]  }
   0x1   :  { %13 = vsyncpa [#allocation6], 0 }
   0x2   :  { %14 = vsyncpa [#allocation9], 0 }
   0x3   :  { %15 = vsyncpa [#allocation4], 0  ;;  %s1334_s24 = smov [#allocation5]  }
   0x4   :  { %s31_s25 = sshll.u32 %s1334_s24, 4  ;;  %s32_s25 = int_to_ptr.vmem [resolvable:$true] %s31_s25 }
   0x5   :  { %s1214_s26 = scalar_lea.vmem %s32_s25, 8192  ;;  %p1219_p1 = scmp.lt.s32.totalorder %s32_s25, %s32_s25 }
   0x6   :  { %p1215_p0 = scmp.ne.s32.totalorder %s32_s25, %s1214_s26  ;;  %p1220_p2 = scmp.lt.s32.totalorder %s1214_s26, %s1214_s26 }
   0x8   :  { %p1221_p3 = por %p1220_p2, %p1219_p1 }
   0xa   :  { %p1222_p4 = pnand %p1221_p3, %p1215_p0 }
   0xc   :  { %1225 = shalt.err (!%p1222_p4)
}
   0xd   :  { %s1335_s27 = smov 512   ;;  %s1336_s28 = smov 32  }
   0xe   :  { %37 = dma.hbm_to_vmem [thread:$0]  %s1464_s1, 8192, %s32_s25, [#allocation6], %s1335_s27, %s1335_s27, %s1336_s28  }
   0xf   :  { %s1337_s8 = smov [#allocation8]  }
  0x10   :  { %s53_s9 = sshll.u32 %s1337_s8, 4  ;;  %s54_s9 = int_to_ptr.vmem [resolvable:$true] %s53_s9 }
  0x11   :  { %s1234_s10 = scalar_lea.vmem %s54_s9, 24576  ;;  %p1239_p6 = scmp.lt.s32.totalorder %s54_s9, %s54_s9 }
  0x12   :  { %p1235_p5 = scmp.ne.s32.totalorder %s54_s9, %s1234_s10  ;;  %p1240_p7 = scmp.lt.s32.totalorder %s1234_s10, %s1234_s10 }
  0x14   :  { %p1241_p8 = por %p1240_p7, %p1239_p6 }
  0x16   :  { %p1242_p9 = pnand %p1241_p8, %p1235_p5 }
  0x18   :  { %1245 = shalt.err (!%p1242_p9)
}
  0x19   :  { %s1338_s11 = smov 384   ;;  %s1339_s12 = smov 24  }
  0x1a   :  { %59 = dma.hbm_to_vmem [thread:$0]  %s1466_s3, 24576, %s54_s9, [#allocation9], %s1338_s11, %s1338_s11, %s1339_s12  }
  0x1b   :  { %s1340_s15 = smov [#allocation2]   ;;  %s1341_s17 = smov [#allocation7]  }
  0x1c   :  { %s22_s16 = sshll.u32 %s1340_s15, 4  ;;  %s44_s1 = sshll.u32 %s1341_s17, 4  ;;  %s23_s16 = int_to_ptr.vmem [resolvable:$true] %s22_s16  ;;  %s45_s1 = int_to_ptr.vmem [resolvable:$true] %s44_s1 }
  0x1d   :  { %s1254_s18 = scalar_lea.vmem %s23_s16, 128  ;;  %p1259_p11 = scmp.lt.s32.totalorder %s23_s16, %s23_s16 }
  0x1e   :  { %p1255_p10 = scmp.ne.s32.totalorder %s23_s16, %s1254_s18  ;;  %p1260_p12 = scmp.lt.s32.totalorder %s1254_s18, %s1254_s18 }
  0x20   :  { %p1261_p13 = por %p1260_p12, %p1259_p11 }
  0x22   :  { %p1262_p0 = pnand %p1261_p13, %p1255_p10 }
  0x24   :  { %1265 = shalt.err (!%p1262_p0)
}
  0x25   :  { %25 = dma.hbm_to_vmem [thread:$0]  %s1463_s0, 128, %s23_s16, [#allocation3]  }
  0x26   :  { %s1274_s21 = scalar_lea.vmem %s45_s1, 64  ;;  %p1279_p2 = scmp.lt.s32.totalorder %s45_s1, %s45_s1 }
  0x27   :  { %p1275_p1 = scmp.ne.s32.totalorder %s45_s1, %s1274_s21  ;;  %p1280_p3 = scmp.lt.s32.totalorder %s1274_s21, %s1274_s21 }
  0x29   :  { %p1281_p4 = por %p1280_p3, %p1279_p2 }
  0x2b   :  { %p1282_p5 = pnand %p1281_p4, %p1275_p1 }
  0x2d   :  { %1285 = shalt.err (!%p1282_p5)
}
  0x2e   :  { %47 = dma.hbm_to_vmem [thread:$0]  %s1465_s2, 64, %s45_s1, [#allocation6]  }
  0x2f   :  { %s1342_s23 = smov [#allocation10]  }
  0x30   :  { %s67_s24 = sshll.u32 %s1342_s23, 4  ;;  %s68_s24 = int_to_ptr.vmem [resolvable:$true] %s67_s24 }
  0x31   :  { %s1294_s25 = scalar_lea.vmem %s68_s24, 6144  ;;  %p1299_p7 = scmp.lt.s32.totalorder %s68_s24, %s68_s24 }
  0x32   :  { %p1295_p6 = scmp.ne.s32.totalorder %s68_s24, %s1294_s25  ;;  %p1300_p8 = scmp.lt.s32.totalorder %s1294_s25, %s1294_s25 }
  0x34   :  { %p1301_p9 = por %p1300_p8, %p1299_p7 }
  0x36   :  { %p1302_p10 = pnand %p1301_p9, %p1295_p6 }
  0x38   :  { %1305 = shalt.err (!%p1302_p10)
}
  0x39   :  { %s1343_s0 = smov 128   ;;  %s1344_s26 = smov 8  }
  0x3a   :  { %73 = dma.hbm_to_vmem [thread:$0]  %s1468_s5, 6144, %s68_s24, [#allocation9], %s1343_s0, %s1343_s0, %s1344_s26  }
  0x3b   :  { %1326 = dma.done.wait [#allocation3], 128  }
  0x3c   :  { %1327 = vsyncadd [#allocation3], 4294967168 }
  0x3d   :  { %1328 = dma.done.wait [#allocation6], 8256  }
  0x3e   :  { %1329 = vsyncadd [#allocation6], 4294959040 }
  0x3f   :  { %1330 = dma.done.wait [#allocation9], 30720  }
  0x40   :  { %1331 = vsyncadd [#allocation9], 4294936576  ;;  %v1345_v0 = vmov 0.0   ;;  %v153_v1 = vld [vmem:[#allocation5 + $0x1e8] sm:$0xff]  ;;  %v155_v2 = vld [vmem:[#allocation5 + $0x1f8] sm:$0xff]  ;;  %vm1346_vm0 = vmmov 0  }
  0x41   :  { %242 = vmatprep.mubr.f32.mxu0 %v1345_v0  ;;  %313 = vmatprep.mubr.f32.mxu1 %v1345_v0  ;;  %v152_v3 = vld [vmem:[#allocation5 + $0x1e0] sm:$0xff]  ;;  %v154_v4 = vld [vmem:[#allocation5 + $0x1f0] sm:$0xff]  ;;  %v149_v5 = vld [vmem:[#allocation5 + $0x1c8] sm:$0xff]  ;;  %s1347_s30 = smov [#allocation11]  }
  0x42   :  { %178 = vmatprep.subr.mxu0 %v153_v1  ;;  %249 = vmatprep.subr.mxu1 %v155_v2  ;;  %v151_v6 = vld [vmem:[#allocation5 + $0x1d8] sm:$0xff]  ;;  %v148_v7 = vld [vmem:[#allocation5 + $0x1c0] sm:$0xff]  ;;  %v150_v8 = vld [vmem:[#allocation5 + $0x1d0] sm:$0xff]  ;;  %s1021_s8 = sshll.u32 %s1347_s30, 4  ;;  %s1022_s8 = int_to_ptr.vmem [resolvable:$true] %s1021_s8 }
  0x43   :  { %179 = vmatpush1.msra.mxu0 %v152_v3  ;;  %250 = vmatpush1.msra.mxu1 %v154_v4  ;;  %v145_v9 = vld [vmem:[#allocation5 + $0x1a8] sm:$0xff]  ;;  %v147_v10 = vld [vmem:[#allocation5 + $0x1b8] sm:$0xff]  ;;  %v144_v11 = vld [vmem:[#allocation5 + $0x1a0] sm:$0xff]  ;;  %s1306_s9 = scalar_lea.vmem %s1022_s8, 128  ;;  %p1311_p12 = scmp.lt.s32.totalorder %s1022_s8, %s1022_s8 }
  0x44   :  { %180 = vmatprep.subr.mxu0 %v149_v5  ;;  %251 = vmatprep.subr.mxu1 %v151_v6  ;;  %v146_v12 = vld [vmem:[#allocation5 + $0x1b0] sm:$0xff]  ;;  %v141_v13 = vld [vmem:[#allocation5 + $0x188] sm:$0xff]  ;;  %v143_v14 = vld [vmem:[#allocation5 + $0x198] sm:$0xff]  ;;  %p1307_p11 = scmp.ne.s32.totalorder %s1022_s8, %s1306_s9  ;;  %p1312_p13 = scmp.lt.s32.totalorder %s1306_s9, %s1306_s9 }
  0x45   :  { %181 = vmatpush1.msra.mxu0 %v148_v7  ;;  %252 = vmatpush1.msra.mxu1 %v150_v8  ;;  %v140_v15 = vld [vmem:[#allocation5 + $0x180] sm:$0xff]  ;;  %v142_v16 = vld [vmem:[#allocation5 + $0x190] sm:$0xff]  ;;  %v137_v17 = vld [vmem:[#allocation5 + $0x168] sm:$0xff] }
  0x46   :  { %182 = vmatprep.subr.mxu0 %v145_v9  ;;  %253 = vmatprep.subr.mxu1 %v147_v10  ;;  %v139_v18 = vld [vmem:[#allocation5 + $0x178] sm:$0xff]  ;;  %v136_v19 = vld [vmem:[#allocation5 + $0x160] sm:$0xff]  ;;  %v138_v20 = vld [vmem:[#allocation5 + $0x170] sm:$0xff]  ;;  %p1313_p0 = por %p1312_p13, %p1311_p12 }
  0x47   :  { %183 = vmatpush1.msra.mxu0 %v144_v11  ;;  %254 = vmatpush1.msra.mxu1 %v146_v12  ;;  %v133_v21 = vld [vmem:[#allocation5 + $0x148] sm:$0xff]  ;;  %v135_v22 = vld [vmem:[#allocation5 + $0x158] sm:$0xff]  ;;  %v132_v23 = vld [vmem:[#allocation5 + $0x140] sm:$0xff] }
  0x48   :  { %184 = vmatprep.subr.mxu0 %v141_v13  ;;  %255 = vmatprep.subr.mxu1 %v143_v14  ;;  %v134_v24 = vld [vmem:[#allocation5 + $0x150] sm:$0xff]  ;;  %v129_v25 = vld [vmem:[#allocation5 + $0x128] sm:$0xff]  ;;  %v131_v26 = vld [vmem:[#allocation5 + $0x138] sm:$0xff]  ;;  %p1314_p1 = pnand %p1313_p0, %p1307_p11 }
  0x49   :  { %185 = vmatpush1.msra.mxu0 %v140_v15  ;;  %256 = vmatpush1.msra.mxu1 %v142_v16  ;;  %v128_v27 = vld [vmem:[#allocation5 + $0x120] sm:$0xff]  ;;  %v130_v28 = vld [vmem:[#allocation5 + $0x130] sm:$0xff]  ;;  %v125_v29 = vld [vmem:[#allocation5 + $0x108] sm:$0xff] }
  0x4a   :  { %186 = vmatprep.subr.mxu0 %v137_v17  ;;  %257 = vmatprep.subr.mxu1 %v139_v18  ;;  %v127_v30 = vld [vmem:[#allocation5 + $0x118] sm:$0xff]  ;;  %v124_v31 = vld [vmem:[#allocation5 + $0x100] sm:$0xff]  ;;  %v126_v32 = vld [vmem:[#allocation5 + $0x110] sm:$0xff] }
  0x4b   :  { %187 = vmatpush1.msra.mxu0 %v136_v19  ;;  %258 = vmatpush1.msra.mxu1 %v138_v20  ;;  %v121_v33 = vld [vmem:[#allocation5 + $0xe8] sm:$0xff]  ;;  %v123_v34 = vld [vmem:[#allocation5 + $0xf8] sm:$0xff]  ;;  %v120_v35 = vld [vmem:[#allocation5 + $0xe0] sm:$0xff] }
  0x4c   :  { %188 = vmatprep.subr.mxu0 %v133_v21  ;;  %259 = vmatprep.subr.mxu1 %v135_v22  ;;  %v122_v36 = vld [vmem:[#allocation5 + $0xf0] sm:$0xff]  ;;  %v117_v37 = vld [vmem:[#allocation5 + $0xc8] sm:$0xff]  ;;  %v119_v38 = vld [vmem:[#allocation5 + $0xd8] sm:$0xff] }
  0x4d   :  { %189 = vmatpush1.msra.mxu0 %v132_v23  ;;  %260 = vmatpush1.msra.mxu1 %v134_v24  ;;  %v116_v39 = vld [vmem:[#allocation5 + $0xc0] sm:$0xff]  ;;  %v118_v40 = vld [vmem:[#allocation5 + $0xd0] sm:$0xff]  ;;  %v113_v41 = vld [vmem:[#allocation5 + $0xa8] sm:$0xff] }
  0x4e   :  { %190 = vmatprep.subr.mxu0 %v129_v25  ;;  %261 = vmatprep.subr.mxu1 %v131_v26  ;;  %v115_v42 = vld [vmem:[#allocation5 + $0xb8] sm:$0xff]  ;;  %v112_v43 = vld [vmem:[#allocation5 + $0xa0] sm:$0xff]  ;;  %v114_v44 = vld [vmem:[#allocation5 + $0xb0] sm:$0xff] }
  0x4f   :  { %191 = vmatpush1.msra.mxu0 %v128_v27  ;;  %262 = vmatpush1.msra.mxu1 %v130_v28  ;;  %v109_v45 = vld [vmem:[#allocation5 + $0x88] sm:$0xff]  ;;  %v111_v46 = vld [vmem:[#allocation5 + $0x98] sm:$0xff]  ;;  %v108_v47 = vld [vmem:[#allocation5 + $0x80] sm:$0xff] }
  0x50   :  { %192 = vmatprep.subr.mxu0 %v125_v29  ;;  %263 = vmatprep.subr.mxu1 %v127_v30  ;;  %v110_v48 = vld [vmem:[#allocation5 + $0x90] sm:$0xff]  ;;  %v105_v49 = vld [vmem:[#allocation5 + $0x68] sm:$0xff]  ;;  %v107_v50 = vld [vmem:[#allocation5 + $0x78] sm:$0xff] }
  0x51   :  { %193 = vmatpush1.msra.mxu0 %v124_v31  ;;  %264 = vmatpush1.msra.mxu1 %v126_v32  ;;  %v104_v51 = vld [vmem:[#allocation5 + $0x60] sm:$0xff]  ;;  %v106_v52 = vld [vmem:[#allocation5 + $0x70] sm:$0xff]  ;;  %v101_v53 = vld [vmem:[#allocation5 + $0x48] sm:$0xff] }
  0x52   :  { %194 = vmatprep.subr.mxu0 %v121_v33  ;;  %265 = vmatprep.subr.mxu1 %v123_v34  ;;  %v103_v54 = vld [vmem:[#allocation5 + $0x58] sm:$0xff]  ;;  %v100_v55 = vld [vmem:[#allocation5 + $0x40] sm:$0xff]  ;;  %v102_v56 = vld [vmem:[#allocation5 + $0x50] sm:$0xff] }
  0x53   :  { %195 = vmatpush1.msra.mxu0 %v120_v35  ;;  %266 = vmatpush1.msra.mxu1 %v122_v36  ;;  %v97_v57 = vld [vmem:[#allocation5 + $0x28] sm:$0xff]  ;;  %v99_v58 = vld [vmem:[#allocation5 + $0x38] sm:$0xff]  ;;  %v96_v59 = vld [vmem:[#allocation5 + $0x20] sm:$0xff] }
  0x54   :  { %196 = vmatprep.subr.mxu0 %v117_v37  ;;  %267 = vmatprep.subr.mxu1 %v119_v38  ;;  %v98_v60 = vld [vmem:[#allocation5 + $0x30] sm:$0xff]  ;;  %v93_v61 = vld [vmem:[#allocation5 + $0x8] sm:$0xff]  ;;  %v95_v62 = vld [vmem:[#allocation5 + $0x18] sm:$0xff] }
  0x55   :  { %197 = vmatpush1.msra.mxu0 %v116_v39  ;;  %268 = vmatpush1.msra.mxu1 %v118_v40  ;;  %v92_v63 = vld [vmem:[#allocation5] sm:$0xff]  ;;  %v94_v1 = vld [vmem:[#allocation5 + $0x10] sm:$0xff]  ;;  %v91_v2 = vld [vmem:[#allocation2] sm:$0xff] }
  0x56   :  { %198 = vmatprep.subr.mxu0 %v113_v41  ;;  %269 = vmatprep.subr.mxu1 %v115_v42  ;;  %v370_v3 = vld [vmem:[#allocation8 + $0x170] sm:$0xff]  ;;  %v369_v5 = vld [vmem:[#allocation8 + $0x168] sm:$0xff]  ;;  %v367_v7 = vld [vmem:[#allocation8 + $0x158] sm:$0xff] }
  0x57   :  { %199 = vmatpush1.msra.mxu0 %v112_v43  ;;  %270 = vmatpush1.msra.mxu1 %v114_v44  ;;  %v466_v4 = vld [vmem:[#allocation8 + $0x470] sm:$0xff]  ;;  %v465_v6 = vld [vmem:[#allocation8 + $0x468] sm:$0xff]  ;;  %v463_v8 = vld [vmem:[#allocation8 + $0x458] sm:$0xff] }
  0x58   :  { %200 = vmatprep.subr.mxu0 %v109_v45  ;;  %271 = vmatprep.subr.mxu1 %v111_v46  ;;  %v366_v9 = vld [vmem:[#allocation8 + $0x150] sm:$0xff]  ;;  %v364_v11 = vld [vmem:[#allocation8 + $0x140] sm:$0xff]  ;;  %v363_v13 = vld [vmem:[#allocation8 + $0x138] sm:$0xff] }
  0x59   :  { %201 = vmatpush1.msra.mxu0 %v108_v47  ;;  %272 = vmatpush1.msra.mxu1 %v110_v48  ;;  %v462_v10 = vld [vmem:[#allocation8 + $0x450] sm:$0xff]  ;;  %v460_v12 = vld [vmem:[#allocation8 + $0x440] sm:$0xff]  ;;  %v459_v14 = vld [vmem:[#allocation8 + $0x438] sm:$0xff] }
  0x5a   :  { %202 = vmatprep.subr.mxu0 %v105_v49  ;;  %273 = vmatprep.subr.mxu1 %v107_v50  ;;  %v361_v15 = vld [vmem:[#allocation8 + $0x128] sm:$0xff]  ;;  %v360_v17 = vld [vmem:[#allocation8 + $0x120] sm:$0xff]  ;;  %v358_v19 = vld [vmem:[#allocation8 + $0x110] sm:$0xff] }
  0x5b   :  { %203 = vmatpush1.msra.mxu0 %v104_v51  ;;  %274 = vmatpush1.msra.mxu1 %v106_v52  ;;  %v457_v16 = vld [vmem:[#allocation8 + $0x428] sm:$0xff]  ;;  %v456_v18 = vld [vmem:[#allocation8 + $0x420] sm:$0xff]  ;;  %v454_v20 = vld [vmem:[#allocation8 + $0x410] sm:$0xff] }
  0x5c   :  { %204 = vmatprep.subr.mxu0 %v101_v53  ;;  %275 = vmatprep.subr.mxu1 %v103_v54  ;;  %v357_v21 = vld [vmem:[#allocation8 + $0x108] sm:$0xff]  ;;  %v355_v23 = vld [vmem:[#allocation8 + $0xf8] sm:$0xff]  ;;  %v354_v25 = vld [vmem:[#allocation8 + $0xf0] sm:$0xff] }
  0x5d   :  { %205 = vmatpush1.msra.mxu0 %v100_v55  ;;  %276 = vmatpush1.msra.mxu1 %v102_v56  ;;  %v453_v22 = vld [vmem:[#allocation8 + $0x408] sm:$0xff]  ;;  %v451_v24 = vld [vmem:[#allocation8 + $0x3f8] sm:$0xff]  ;;  %v450_v26 = vld [vmem:[#allocation8 + $0x3f0] sm:$0xff] }
  0x5e   :  { %206 = vmatprep.subr.mxu0 %v97_v57  ;;  %277 = vmatprep.subr.mxu1 %v99_v58  ;;  %v352_v27 = vld [vmem:[#allocation8 + $0xe0] sm:$0xff]  ;;  %v351_v29 = vld [vmem:[#allocation8 + $0xd8] sm:$0xff]  ;;  %v349_v31 = vld [vmem:[#allocation8 + $0xc8] sm:$0xff] }
  0x5f   :  { %207 = vmatpush1.msra.mxu0 %v96_v59  ;;  %278 = vmatpush1.msra.mxu1 %v98_v60  ;;  %v448_v28 = vld [vmem:[#allocation8 + $0x3e0] sm:$0xff]  ;;  %v447_v30 = vld [vmem:[#allocation8 + $0x3d8] sm:$0xff]  ;;  %v445_v32 = vld [vmem:[#allocation8 + $0x3c8] sm:$0xff] }
  0x60   :  { %208 = vmatprep.subr.mxu0 %v93_v61  ;;  %279 = vmatprep.subr.mxu1 %v95_v62  ;;  %v348_v33 = vld [vmem:[#allocation8 + $0xc0] sm:$0xff]  ;;  %v346_v35 = vld [vmem:[#allocation8 + $0xb0] sm:$0xff]  ;;  %v345_v37 = vld [vmem:[#allocation8 + $0xa8] sm:$0xff] }
  0x61   :  { %209 = vmatpush1.msra.mxu0 %v92_v63  ;;  %280 = vmatpush1.msra.mxu1 %v94_v1  ;;  %v444_v34 = vld [vmem:[#allocation8 + $0x3c0] sm:$0xff]  ;;  %v442_v36 = vld [vmem:[#allocation8 + $0x3b0] sm:$0xff]  ;;  %v441_v38 = vld [vmem:[#allocation8 + $0x3a8] sm:$0xff] }
  0x62   :  { %243 = vmatmul.mubr.f32.vlgmr.msra.gmra.mxu0 %v91_v2  ;;  %314 = vmatmul.mubr.f32.vlgmr.msra.gmra.mxu1 %v91_v2  ;;  %v343_v39 = vld [vmem:[#allocation8 + $0x98] sm:$0xff]  ;;  %v342_v41 = vld [vmem:[#allocation8 + $0x90] sm:$0xff]  ;;  %v340_v43 = vld [vmem:[#allocation8 + $0x80] sm:$0xff] }
  0x63   :  { %533 = vmatprep.subr.mxu0 %v370_v3  ;;  %604 = vmatprep.subr.mxu1 %v466_v4  ;;  %v439_v40 = vld [vmem:[#allocation8 + $0x398] sm:$0xff]  ;;  %v438_v42 = vld [vmem:[#allocation8 + $0x390] sm:$0xff]  ;;  %v436_v44 = vld [vmem:[#allocation8 + $0x380] sm:$0xff] }
  0x64   :  { %534 = vmatpush1.msra.mxu0 %v369_v5  ;;  %605 = vmatpush1.msra.mxu1 %v465_v6  ;;  %v339_v45 = vld [vmem:[#allocation8 + $0x78] sm:$0xff]  ;;  %v337_v47 = vld [vmem:[#allocation8 + $0x68] sm:$0xff]  ;;  %v336_v49 = vld [vmem:[#allocation8 + $0x60] sm:$0xff] }
  0x65   :  { %535 = vmatprep.subr.mxu0 %v367_v7  ;;  %606 = vmatprep.subr.mxu1 %v463_v8  ;;  %v435_v46 = vld [vmem:[#allocation8 + $0x378] sm:$0xff]  ;;  %v433_v48 = vld [vmem:[#allocation8 + $0x368] sm:$0xff]  ;;  %v432_v50 = vld [vmem:[#allocation8 + $0x360] sm:$0xff] }
  0x66   :  { %536 = vmatpush1.msra.mxu0 %v366_v9  ;;  %607 = vmatpush1.msra.mxu1 %v462_v10  ;;  %v334_v51 = vld [vmem:[#allocation8 + $0x50] sm:$0xff]  ;;  %v333_v53 = vld [vmem:[#allocation8 + $0x48] sm:$0xff]  ;;  %v331_v55 = vld [vmem:[#allocation8 + $0x38] sm:$0xff] }
  0x67   :  { %537 = vmatprep.subr.mxu0 %v364_v11  ;;  %608 = vmatprep.subr.mxu1 %v460_v12  ;;  %v430_v52 = vld [vmem:[#allocation8 + $0x350] sm:$0xff]  ;;  %v429_v54 = vld [vmem:[#allocation8 + $0x348] sm:$0xff]  ;;  %v427_v56 = vld [vmem:[#allocation8 + $0x338] sm:$0xff] }
  0x68   :  { %538 = vmatpush1.msra.mxu0 %v363_v13  ;;  %609 = vmatpush1.msra.mxu1 %v459_v14  ;;  %v330_v57 = vld [vmem:[#allocation8 + $0x30] sm:$0xff]  ;;  %v328_v59 = vld [vmem:[#allocation8 + $0x20] sm:$0xff]  ;;  %v327_v61 = vld [vmem:[#allocation8 + $0x18] sm:$0xff] }
  0x69   :  { %539 = vmatprep.subr.mxu0 %v361_v15  ;;  %610 = vmatprep.subr.mxu1 %v457_v16  ;;  %v426_v58 = vld [vmem:[#allocation8 + $0x330] sm:$0xff]  ;;  %v424_v60 = vld [vmem:[#allocation8 + $0x320] sm:$0xff]  ;;  %v423_v62 = vld [vmem:[#allocation8 + $0x318] sm:$0xff] }
  0x6a   :  { %540 = vmatpush1.msra.mxu0 %v360_v17  ;;  %611 = vmatpush1.msra.mxu1 %v456_v18  ;;  %v325_v63 = vld [vmem:[#allocation8 + $0x8] sm:$0xff]  ;;  %v324_v2 = vld [vmem:[#allocation8] sm:$0xff]  ;;  %v418_v4 = vld [vmem:[#allocation8 + $0x2f0] sm:$0xff] }
  0x6b   :  { %541 = vmatprep.subr.mxu0 %v358_v19  ;;  %612 = vmatprep.subr.mxu1 %v454_v20  ;;  %v421_v1 = vld [vmem:[#allocation8 + $0x308] sm:$0xff]  ;;  %v420_v3 = vld [vmem:[#allocation8 + $0x300] sm:$0xff]  ;;  %v514_v5 = vld [vmem:[#allocation8 + $0x5f0] sm:$0xff] }
  0x6c   :  { %542 = vmatpush1.msra.mxu0 %v357_v21  ;;  %613 = vmatpush1.msra.mxu1 %v453_v22  ;;  %v417_v6 = vld [vmem:[#allocation8 + $0x2e8] sm:$0xff]  ;;  %v415_v8 = vld [vmem:[#allocation8 + $0x2d8] sm:$0xff]  ;;  %v414_v10 = vld [vmem:[#allocation8 + $0x2d0] sm:$0xff] }
  0x6d   :  { %543 = vmatprep.subr.mxu0 %v355_v23  ;;  %614 = vmatprep.subr.mxu1 %v451_v24  ;;  %v513_v7 = vld [vmem:[#allocation8 + $0x5e8] sm:$0xff]  ;;  %v511_v9 = vld [vmem:[#allocation8 + $0x5d8] sm:$0xff]  ;;  %v510_v11 = vld [vmem:[#allocation8 + $0x5d0] sm:$0xff] }
  0x6e   :  { %544 = vmatpush1.msra.mxu0 %v354_v25  ;;  %615 = vmatpush1.msra.mxu1 %v450_v26  ;;  %v412_v12 = vld [vmem:[#allocation8 + $0x2c0] sm:$0xff]  ;;  %v411_v14 = vld [vmem:[#allocation8 + $0x2b8] sm:$0xff]  ;;  %v409_v16 = vld [vmem:[#allocation8 + $0x2a8] sm:$0xff] }
  0x6f   :  { %545 = vmatprep.subr.mxu0 %v352_v27  ;;  %616 = vmatprep.subr.mxu1 %v448_v28  ;;  %v508_v13 = vld [vmem:[#allocation8 + $0x5c0] sm:$0xff]  ;;  %v507_v15 = vld [vmem:[#allocation8 + $0x5b8] sm:$0xff]  ;;  %v505_v17 = vld [vmem:[#allocation8 + $0x5a8] sm:$0xff] }
  0x70   :  { %546 = vmatpush1.msra.mxu0 %v351_v29  ;;  %617 = vmatpush1.msra.mxu1 %v447_v30  ;;  %v408_v18 = vld [vmem:[#allocation8 + $0x2a0] sm:$0xff]  ;;  %v406_v20 = vld [vmem:[#allocation8 + $0x290] sm:$0xff]  ;;  %v405_v22 = vld [vmem:[#allocation8 + $0x288] sm:$0xff] }
  0x71   :  { %547 = vmatprep.subr.mxu0 %v349_v31  ;;  %618 = vmatprep.subr.mxu1 %v445_v32  ;;  %v504_v19 = vld [vmem:[#allocation8 + $0x5a0] sm:$0xff]  ;;  %v502_v21 = vld [vmem:[#allocation8 + $0x590] sm:$0xff]  ;;  %v501_v23 = vld [vmem:[#allocation8 + $0x588] sm:$0xff] }
  0x72   :  { %548 = vmatpush1.msra.mxu0 %v348_v33  ;;  %619 = vmatpush1.msra.mxu1 %v444_v34  ;;  %v403_v24 = vld [vmem:[#allocation8 + $0x278] sm:$0xff]  ;;  %v402_v26 = vld [vmem:[#allocation8 + $0x270] sm:$0xff]  ;;  %v400_v28 = vld [vmem:[#allocation8 + $0x260] sm:$0xff] }
  0x73   :  { %549 = vmatprep.subr.mxu0 %v346_v35  ;;  %620 = vmatprep.subr.mxu1 %v442_v36  ;;  %v499_v25 = vld [vmem:[#allocation8 + $0x578] sm:$0xff]  ;;  %v498_v27 = vld [vmem:[#allocation8 + $0x570] sm:$0xff]  ;;  %v496_v29 = vld [vmem:[#allocation8 + $0x560] sm:$0xff] }
  0x74   :  { %550 = vmatpush1.msra.mxu0 %v345_v37  ;;  %621 = vmatpush1.msra.mxu1 %v441_v38  ;;  %v399_v30 = vld [vmem:[#allocation8 + $0x258] sm:$0xff]  ;;  %v397_v32 = vld [vmem:[#allocation8 + $0x248] sm:$0xff]  ;;  %v396_v34 = vld [vmem:[#allocation8 + $0x240] sm:$0xff] }
  0x75   :  { %551 = vmatprep.subr.mxu0 %v343_v39  ;;  %622 = vmatprep.subr.mxu1 %v439_v40  ;;  %v495_v31 = vld [vmem:[#allocation8 + $0x558] sm:$0xff]  ;;  %v493_v33 = vld [vmem:[#allocation8 + $0x548] sm:$0xff]  ;;  %v492_v35 = vld [vmem:[#allocation8 + $0x540] sm:$0xff] }
  0x76   :  { %552 = vmatpush1.msra.mxu0 %v342_v41  ;;  %623 = vmatpush1.msra.mxu1 %v438_v42  ;;  %v394_v36 = vld [vmem:[#allocation8 + $0x230] sm:$0xff]  ;;  %v393_v38 = vld [vmem:[#allocation8 + $0x228] sm:$0xff]  ;;  %v391_v40 = vld [vmem:[#allocation8 + $0x218] sm:$0xff] }
  0x77   :  { %553 = vmatprep.subr.mxu0 %v340_v43  ;;  %624 = vmatprep.subr.mxu1 %v436_v44  ;;  %v490_v37 = vld [vmem:[#allocation8 + $0x530] sm:$0xff]  ;;  %v489_v39 = vld [vmem:[#allocation8 + $0x528] sm:$0xff]  ;;  %v487_v41 = vld [vmem:[#allocation8 + $0x518] sm:$0xff] }
  0x78   :  { %554 = vmatpush1.msra.mxu0 %v339_v45  ;;  %625 = vmatpush1.msra.mxu1 %v435_v46  ;;  %v390_v42 = vld [vmem:[#allocation8 + $0x210] sm:$0xff]  ;;  %v388_v44 = vld [vmem:[#allocation8 + $0x200] sm:$0xff]  ;;  %v387_v46 = vld [vmem:[#allocation8 + $0x1f8] sm:$0xff] }
  0x79   :  { %555 = vmatprep.subr.mxu0 %v337_v47  ;;  %626 = vmatprep.subr.mxu1 %v433_v48  ;;  %v486_v43 = vld [vmem:[#allocation8 + $0x510] sm:$0xff]  ;;  %v484_v45 = vld [vmem:[#allocation8 + $0x500] sm:$0xff]  ;;  %v483_v47 = vld [vmem:[#allocation8 + $0x4f8] sm:$0xff] }
  0x7a   :  { %556 = vmatpush1.msra.mxu0 %v336_v49  ;;  %627 = vmatpush1.msra.mxu1 %v432_v50  ;;  %v385_v48 = vld [vmem:[#allocation8 + $0x1e8] sm:$0xff]  ;;  %v384_v50 = vld [vmem:[#allocation8 + $0x1e0] sm:$0xff] }
  0x7b   :  { %557 = vmatprep.subr.mxu0 %v334_v51  ;;  %628 = vmatprep.subr.mxu1 %v430_v52  ;;  %v481_v49 = vld [vmem:[#allocation8 + $0x4e8] sm:$0xff]  ;;  %v480_v51 = vld [vmem:[#allocation8 + $0x4e0] sm:$0xff]  ;;  %v382_v52 = vld [vmem:[#allocation8 + $0x1d0] sm:$0xff] }
  0x7c   :  { %558 = vmatpush1.msra.mxu0 %v333_v53  ;;  %629 = vmatpush1.msra.mxu1 %v429_v54  ;;  %v478_v53 = vld [vmem:[#allocation8 + $0x4d0] sm:$0xff]  ;;  %v381_v54 = vld [vmem:[#allocation8 + $0x1c8] sm:$0xff] }
  0x7d   :  { %559 = vmatprep.subr.mxu0 %v331_v55  ;;  %630 = vmatprep.subr.mxu1 %v427_v56  ;;  %v477_v55 = vld [vmem:[#allocation8 + $0x4c8] sm:$0xff]  ;;  %v379_v56 = vld [vmem:[#allocation8 + $0x1b8] sm:$0xff] }
  0x7e   :  { %560 = vmatpush1.msra.mxu0 %v330_v57  ;;  %631 = vmatpush1.msra.mxu1 %v426_v58  ;;  %v475_v57 = vld [vmem:[#allocation8 + $0x4b8] sm:$0xff]  ;;  %v378_v58 = vld [vmem:[#allocation8 + $0x1b0] sm:$0xff] }
  0x7f   :  { %561 = vmatprep.subr.mxu0 %v328_v59  ;;  %632 = vmatprep.subr.mxu1 %v424_v60  ;;  %v474_v59 = vld [vmem:[#allocation8 + $0x4b0] sm:$0xff]  ;;  %v376_v60 = vld [vmem:[#allocation8 + $0x1a0] sm:$0xff] }
  0x80   :  { %562 = vmatpush1.msra.mxu0 %v327_v61  ;;  %633 = vmatpush1.msra.mxu1 %v423_v62  ;;  %v472_v61 = vld [vmem:[#allocation8 + $0x4a0] sm:$0xff]  ;;  %v375_v62 = vld [vmem:[#allocation8 + $0x198] sm:$0xff] }
  0x81   :  { %563 = vmatprep.subr.mxu0 %v325_v63  ;;  %634 = vmatprep.subr.mxu1 %v421_v1  ;;  %v471_v63 = vld [vmem:[#allocation8 + $0x498] sm:$0xff]  ;;  %v373_v1 = vld [vmem:[#allocation8 + $0x188] sm:$0xff] }
  0x82   :  { %564 = vmatpush1.msra.mxu0 %v324_v2  ;;  %635 = vmatpush1.msra.mxu1 %v420_v3  ;;  %v469_v2 = vld [vmem:[#allocation8 + $0x488] sm:$0xff]  ;;  %v372_v3 = vld [vmem:[#allocation8 + $0x180] sm:$0xff] }
  0x83   :  { %565 = vmatprep.subr.mxu0 %v418_v4  ;;  %636 = vmatprep.subr.mxu1 %v514_v5  ;;  %v468_v4 = vld [vmem:[#allocation8 + $0x480] sm:$0xff]  ;;  %v419_v5 = vld [vmem:[#allocation8 + $0x2f8] sm:$0xff] }
  0x84   :  { %566 = vmatpush2.msra.mxu0 %v417_v6  ;;  %637 = vmatpush2.msra.mxu1 %v513_v7  ;;  %v515_v6 = vld [vmem:[#allocation8 + $0x5f8] sm:$0xff]  ;;  %v158_v7 = vlaneseq }
  0x85   :  { %567 = vmatprep.subr.mxu0 %v415_v8  ;;  %638 = vmatprep.subr.mxu1 %v511_v9 }
  0x86   :  { %568 = vmatpush2.msra.mxu0 %v414_v10  ;;  %639 = vmatpush2.msra.mxu1 %v510_v11  ;;  %v1405_v8 = vshrl.u32 %v158_v7, 7  ;;  %v156_v11 = vld [vmem:[#allocation7] sm:$0xf]  ;;  %v341_v7 = vld [vmem:[#allocation8 + $0x88] sm:$0xff] }
  0x87   :  { %569 = vmatprep.subr.mxu0 %v412_v12  ;;  %640 = vmatprep.subr.mxu1 %v508_v13 }
  0x88   :  { %570 = vmatpush2.msra.mxu0 %v411_v14  ;;  %641 = vmatpush2.msra.mxu1 %v507_v15  ;;  %v168_v9 = vsub.s32 2, %v1405_v8  ;;  %v160_v10 = vsub.s32 0, %v1405_v8  ;;  %v164_v12 = vsub.s32 1, %v1405_v8  ;;  %v172_v13 = vsub.s32 3, %v1405_v8 }
  0x89   :  { %571 = vmatprep.subr.mxu0 %v409_v16  ;;  %642 = vmatprep.subr.mxu1 %v505_v17 }
  0x8a   :  { %572 = vmatpush2.msra.mxu0 %v408_v18  ;;  %643 = vmatpush2.msra.mxu1 %v504_v19  ;;  %v169_v14 = vrot.slane %v156_v11, %v168_v9  ;;  %v161_v15 = vrot.slane %v156_v11, %v160_v10  ;;  %v165_v16 = vrot.slane %v156_v11, %v164_v12 }
  0x8b   :  { %573 = vmatprep.subr.mxu0 %v406_v20  ;;  %644 = vmatprep.subr.mxu1 %v502_v21  ;;  %v173_v17 = vrot.slane %v156_v11, %v172_v13  ;;  %v437_v11 = vld [vmem:[#allocation8 + $0x388] sm:$0xff]  ;;  %v386_v13 = vld [vmem:[#allocation8 + $0x1f0] sm:$0xff] }
  0x8c   :  { %574 = vmatpush2.msra.mxu0 %v405_v22  ;;  %645 = vmatpush2.msra.mxu1 %v501_v23 }
  0x8d   :  { %575 = vmatprep.subr.mxu0 %v403_v24  ;;  %646 = vmatprep.subr.mxu1 %v499_v25 }
  0x8e   :  { %576 = vmatpush2.msra.mxu0 %v402_v26  ;;  %647 = vmatpush2.msra.mxu1 %v498_v27 }
  0x8f   :  { %577 = vmatprep.subr.mxu0 %v400_v28  ;;  %648 = vmatprep.subr.mxu1 %v496_v29 }
  0x90   :  { %578 = vmatpush2.msra.mxu0 %v399_v30  ;;  %649 = vmatpush2.msra.mxu1 %v495_v31  ;;  %v371_v30 = vld [vmem:[#allocation8 + $0x178] sm:$0xff] }
  0x91   :  { %579 = vmatprep.subr.mxu0 %v397_v32  ;;  %650 = vmatprep.subr.mxu1 %v493_v33  ;;  %v467_v31 = vld [vmem:[#allocation8 + $0x478] sm:$0xff]  ;;  %v416_v32 = vld [vmem:[#allocation8 + $0x2e0] sm:$0xff] }
  0x92   :  { %580 = vmatpush2.msra.mxu0 %v396_v34  ;;  %651 = vmatpush2.msra.mxu1 %v492_v35  ;;  %v512_v33 = vld [vmem:[#allocation8 + $0x5e0] sm:$0xff] }
  0x93   :  { %581 = vmatprep.subr.mxu0 %v394_v36  ;;  %652 = vmatprep.subr.mxu1 %v490_v37  ;;  %v368_v34 = vld [vmem:[#allocation8 + $0x160] sm:$0xff]  ;;  %v413_v36 = vld [vmem:[#allocation8 + $0x2c8] sm:$0xff] }
  0x94   :  { %582 = vmatpush2.msra.mxu0 %v393_v38  ;;  %653 = vmatpush2.msra.mxu1 %v489_v39  ;;  %v464_v35 = vld [vmem:[#allocation8 + $0x460] sm:$0xff]  ;;  %v509_v37 = vld [vmem:[#allocation8 + $0x5c8] sm:$0xff] }
  0x95   :  { %583 = vmatprep.subr.mxu0 %v391_v40  ;;  %654 = vmatprep.subr.mxu1 %v487_v41  ;;  %v365_v38 = vld [vmem:[#allocation8 + $0x148] sm:$0xff]  ;;  %v410_v40 = vld [vmem:[#allocation8 + $0x2b0] sm:$0xff] }
  0x96   :  { %584 = vmatpush2.msra.mxu0 %v390_v42  ;;  %655 = vmatpush2.msra.mxu1 %v486_v43  ;;  %v461_v39 = vld [vmem:[#allocation8 + $0x448] sm:$0xff]  ;;  %v506_v41 = vld [vmem:[#allocation8 + $0x5b0] sm:$0xff] }
  0x97   :  { %585 = vmatprep.subr.mxu0 %v388_v44  ;;  %656 = vmatprep.subr.mxu1 %v484_v45  ;;  %v362_v42 = vld [vmem:[#allocation8 + $0x130] sm:$0xff]  ;;  %v407_v44 = vld [vmem:[#allocation8 + $0x298] sm:$0xff] }
  0x98   :  { %586 = vmatpush2.msra.mxu0 %v387_v46  ;;  %657 = vmatpush2.msra.mxu1 %v483_v47  ;;  %v458_v43 = vld [vmem:[#allocation8 + $0x430] sm:$0xff]  ;;  %v503_v45 = vld [vmem:[#allocation8 + $0x598] sm:$0xff] }
  0x99   :  { %587 = vmatprep.subr.mxu0 %v385_v48  ;;  %658 = vmatprep.subr.mxu1 %v481_v49  ;;  %v359_v46 = vld [vmem:[#allocation8 + $0x118] sm:$0xff]  ;;  %v404_v48 = vld [vmem:[#allocation8 + $0x280] sm:$0xff] }
  0x9a   :  { %588 = vmatpush2.msra.mxu0 %v384_v50  ;;  %659 = vmatpush2.msra.mxu1 %v480_v51  ;;  %v455_v47 = vld [vmem:[#allocation8 + $0x418] sm:$0xff]  ;;  %v500_v49 = vld [vmem:[#allocation8 + $0x580] sm:$0xff] }
  0x9b   :  { %589 = vmatprep.subr.mxu0 %v382_v52  ;;  %660 = vmatprep.subr.mxu1 %v478_v53  ;;  %v356_v50 = vld [vmem:[#allocation8 + $0x100] sm:$0xff]  ;;  %v401_v52 = vld [vmem:[#allocation8 + $0x268] sm:$0xff] }
  0x9c   :  { %590 = vmatpush2.msra.mxu0 %v381_v54  ;;  %661 = vmatpush2.msra.mxu1 %v477_v55  ;;  %v452_v51 = vld [vmem:[#allocation8 + $0x400] sm:$0xff]  ;;  %v497_v53 = vld [vmem:[#allocation8 + $0x568] sm:$0xff] }
  0x9d   :  { %591 = vmatprep.subr.mxu0 %v379_v56  ;;  %662 = vmatprep.subr.mxu1 %v475_v57  ;;  %v353_v54 = vld [vmem:[#allocation8 + $0xe8] sm:$0xff]  ;;  %v398_v56 = vld [vmem:[#allocation8 + $0x250] sm:$0xff] }
  0x9e   :  { %592 = vmatpush2.msra.mxu0 %v378_v58  ;;  %663 = vmatpush2.msra.mxu1 %v474_v59  ;;  %v449_v55 = vld [vmem:[#allocation8 + $0x3e8] sm:$0xff]  ;;  %v494_v57 = vld [vmem:[#allocation8 + $0x550] sm:$0xff] }
  0x9f   :  { %593 = vmatprep.subr.mxu0 %v376_v60  ;;  %664 = vmatprep.subr.mxu1 %v472_v61  ;;  %v350_v58 = vld [vmem:[#allocation8 + $0xd0] sm:$0xff]  ;;  %v395_v60 = vld [vmem:[#allocation8 + $0x238] sm:$0xff] }
  0xa0   :  { %594 = vmatpush2.msra.mxu0 %v375_v62  ;;  %665 = vmatpush2.msra.mxu1 %v471_v63  ;;  %v446_v59 = vld [vmem:[#allocation8 + $0x3d0] sm:$0xff]  ;;  %v491_v61 = vld [vmem:[#allocation8 + $0x538] sm:$0xff] }
  0xa1   :  { %595 = vmatprep.subr.mxu0 %v373_v1  ;;  %666 = vmatprep.subr.mxu1 %v469_v2  ;;  %v347_v62 = vld [vmem:[#allocation8 + $0xb8] sm:$0xff]  ;;  %v392_v1 = vld [vmem:[#allocation8 + $0x220] sm:$0xff] }
  0xa2   :  { %596 = vmatpush2.msra.mxu0 %v372_v3  ;;  %667 = vmatpush2.msra.mxu1 %v468_v4  ;;  %v443_v63 = vld [vmem:[#allocation8 + $0x3b8] sm:$0xff]  ;;  %v488_v2 = vld [vmem:[#allocation8 + $0x520] sm:$0xff] }
  0xa3   :  { %1033 = vmatprep.subr.mxu0 %v419_v5  ;;  %1068 = vmatprep.subr.mxu1 %v515_v6  ;;  %v344_v3 = vld [vmem:[#allocation8 + $0xa0] sm:$0xff]  ;;  %v389_v5 = vld [vmem:[#allocation8 + $0x208] sm:$0xff] }
  0xa4   :  { %v440_v4 = vld [vmem:[#allocation8 + $0x3a0] sm:$0xff]  ;;  %v485_v6 = vld [vmem:[#allocation8 + $0x508] sm:$0xff] }
 0x122   :  { %v244_v18 = vpop.f32.mrf.mxu0  ;;  %v315_v19 = vpop.f32.mrf.mxu1 }
 0x123   :  { %v1417_v20 = vadd.f32 %v315_v19, %v169_v14  ;;  %v1419_v21 = vadd.f32 %v244_v18, %v161_v15  ;;  %v482_v14 = vld [vmem:[#allocation8 + $0x4f0] sm:$0xff]  ;;  %v479_v18 = vld [vmem:[#allocation8 + $0x4d8] sm:$0xff] }
 0x124   :  { %v246_v22 = vpop.f32.mrf.mxu0  ;;  %v317_v23 = vpop.f32.mrf.mxu1  ;;  %v338_v15 = vld [vmem:[#allocation8 + $0x70] sm:$0xff]  ;;  %v335_v19 = vld [vmem:[#allocation8 + $0x58] sm:$0xff] }
 0x125   :  { %v247_v24 = vadd.f32 %v246_v22, %v165_v16  ;;  %v318_v25 = vadd.f32 %v317_v23, %v173_v17  ;;  %v322_v26 = vmax.f32 %v1417_v20, 0.0  ;;  %v320_v29 = vmax.f32 %v1419_v21, 0.0  ;;  %v434_v16 = vld [vmem:[#allocation8 + $0x370] sm:$0xff]  ;;  %v383_v17 = vld [vmem:[#allocation8 + $0x1d8] sm:$0xff]  ;;  %v380_v23 = vld [vmem:[#allocation8 + $0x1c0] sm:$0xff] }
 0x126   :  { %v431_v22 = vld [vmem:[#allocation8 + $0x358] sm:$0xff]  ;;  %v844_v20 = vld [vmem:[#allocation10 + $0xd0] sm:$0xff] }
 0x127   :  { %v321_v27 = vmax.f32 %v247_v24, 0.0  ;;  %v323_v28 = vmax.f32 %v318_v25, 0.0  ;;  %v476_v24 = vld [vmem:[#allocation8 + $0x4c0] sm:$0xff]  ;;  %v829_v21 = vld [vmem:[#allocation10 + $0x58] sm:$0xff] }
 0x128   :  { %v332_v25 = vld [vmem:[#allocation8 + $0x40] sm:$0xff] }
 0x129   :  { %597 = vmatprep.mubr.f32.mxu0 %v321_v27  ;;  %668 = vmatprep.mubr.f32.mxu1 %v323_v28 }
 0x12a   :  { %598 = vmatmul.mubr.f32.vlgmr.msra.gmra.mxu0 %v320_v29  ;;  %669 = vmatmul.mubr.f32.vlgmr.msra.gmra.mxu1 %v322_v26 }
 0x12b   :  { %1034 = vmatpush3.msra.mxu0 %v371_v30  ;;  %1069 = vmatpush3.msra.mxu1 %v467_v31  ;;  %v473_v30 = vld [vmem:[#allocation8 + $0x4a8] sm:$0xff] }
 0x12c   :  { %1035 = vmatprep.subr.mxu0 %v416_v32  ;;  %739 = vmatprep.mubr.f32.mxu0 %v321_v27  ;;  %v428_v27 = vld [vmem:[#allocation8 + $0x340] sm:$0xff]  ;;  %v329_v31 = vld [vmem:[#allocation8 + $0x28] sm:$0xff] }
 0x12d   :  { %1070 = vmatprep.subr.mxu1 %v512_v33  ;;  %809 = vmatprep.mubr.f32.mxu1 %v323_v28  ;;  %v377_v28 = vld [vmem:[#allocation8 + $0x1a8] sm:$0xff]  ;;  %v374_v33 = vld [vmem:[#allocation8 + $0x190] sm:$0xff] }
 0x12e   :  { %1036 = vmatpush3.msra.mxu0 %v368_v34  ;;  %1071 = vmatpush3.msra.mxu1 %v464_v35  ;;  %v425_v32 = vld [vmem:[#allocation8 + $0x328] sm:$0xff]  ;;  %v470_v34 = vld [vmem:[#allocation8 + $0x490] sm:$0xff] }
 0x12f   :  { %1037 = vmatprep.subr.mxu0 %v413_v36  ;;  %1072 = vmatprep.subr.mxu1 %v509_v37  ;;  %v326_v35 = vld [vmem:[#allocation8 + $0x10] sm:$0xff]  ;;  %v849_v37 = vld [vmem:[#allocation10 + $0xf8] sm:$0xff] }
 0x130   :  { %1038 = vmatpush3.msra.mxu0 %v365_v38  ;;  %1073 = vmatpush3.msra.mxu1 %v461_v39  ;;  %v422_v36 = vld [vmem:[#allocation8 + $0x310] sm:$0xff]  ;;  %v833_v38 = vld [vmem:[#allocation10 + $0x78] sm:$0xff] }
 0x131   :  { %1039 = vmatprep.subr.mxu0 %v410_v40  ;;  %1074 = vmatprep.subr.mxu1 %v506_v41  ;;  %v848_v39 = vld [vmem:[#allocation10 + $0xf0] sm:$0xff]  ;;  %v847_v41 = vld [vmem:[#allocation10 + $0xe8] sm:$0xff] }
 0x132   :  { %1040 = vmatpush3.msra.mxu0 %v362_v42  ;;  %1075 = vmatpush3.msra.mxu1 %v458_v43  ;;  %v832_v40 = vld [vmem:[#allocation10 + $0x70] sm:$0xff]  ;;  %v831_v42 = vld [vmem:[#allocation10 + $0x68] sm:$0xff]  ;;  %v846_v43 = vld [vmem:[#allocation10 + $0xe0] sm:$0xff] }
 0x133   :  { %1041 = vmatprep.subr.mxu0 %v407_v44  ;;  %1076 = vmatprep.subr.mxu1 %v503_v45  ;;  %v830_v44 = vld [vmem:[#allocation10 + $0x60] sm:$0xff]  ;;  %v845_v45 = vld [vmem:[#allocation10 + $0xd8] sm:$0xff] }
 0x134   :  { %1042 = vmatpush3.msra.mxu0 %v359_v46  ;;  %1077 = vmatpush3.msra.mxu1 %v455_v47  ;;  %v827_v46 = vld [vmem:[#allocation10 + $0x48] sm:$0xff]  ;;  %v842_v47 = vld [vmem:[#allocation10 + $0xc0] sm:$0xff] }
 0x135   :  { %1043 = vmatprep.subr.mxu0 %v404_v48  ;;  %1078 = vmatprep.subr.mxu1 %v500_v49  ;;  %v826_v48 = vld [vmem:[#allocation10 + $0x40] sm:$0xff]  ;;  %v841_v49 = vld [vmem:[#allocation10 + $0xb8] sm:$0xff] }
 0x136   :  { %1044 = vmatpush3.msra.mxu0 %v356_v50  ;;  %1079 = vmatpush3.msra.mxu1 %v452_v51  ;;  %v825_v50 = vld [vmem:[#allocation10 + $0x38] sm:$0xff]  ;;  %v840_v51 = vld [vmem:[#allocation10 + $0xb0] sm:$0xff] }
 0x137   :  { %1045 = vmatprep.subr.mxu0 %v401_v52  ;;  %1080 = vmatprep.subr.mxu1 %v497_v53  ;;  %v824_v52 = vld [vmem:[#allocation10 + $0x30] sm:$0xff]  ;;  %v839_v53 = vld [vmem:[#allocation10 + $0xa8] sm:$0xff] }
 0x138   :  { %1046 = vmatpush3.msra.mxu0 %v353_v54  ;;  %1081 = vmatpush3.msra.mxu1 %v449_v55  ;;  %v823_v54 = vld [vmem:[#allocation10 + $0x28] sm:$0xff]  ;;  %v838_v55 = vld [vmem:[#allocation10 + $0xa0] sm:$0xff] }
 0x139   :  { %1047 = vmatprep.subr.mxu0 %v398_v56  ;;  %1082 = vmatprep.subr.mxu1 %v494_v57  ;;  %v822_v56 = vld [vmem:[#allocation10 + $0x20] sm:$0xff]  ;;  %v837_v57 = vld [vmem:[#allocation10 + $0x98] sm:$0xff] }
 0x13a   :  { %1048 = vmatpush3.msra.mxu0 %v350_v58  ;;  %1083 = vmatpush3.msra.mxu1 %v446_v59  ;;  %v821_v58 = vld [vmem:[#allocation10 + $0x18] sm:$0xff]  ;;  %v836_v59 = vld [vmem:[#allocation10 + $0x90] sm:$0xff] }
 0x13b   :  { %1049 = vmatprep.subr.mxu0 %v395_v60  ;;  %1084 = vmatprep.subr.mxu1 %v491_v61  ;;  %v820_v60 = vld [vmem:[#allocation10 + $0x10] sm:$0xff]  ;;  %v835_v61 = vld [vmem:[#allocation10 + $0x88] sm:$0xff] }
 0x13c   :  { %1050 = vmatpush3.msra.mxu0 %v347_v62  ;;  %1085 = vmatpush3.msra.mxu1 %v443_v63  ;;  %v819_v62 = vld [vmem:[#allocation10 + $0x8] sm:$0xff]  ;;  %v834_v63 = vld [vmem:[#allocation10 + $0x80] sm:$0xff] }
 0x13d   :  { %1051 = vmatprep.subr.mxu0 %v392_v1  ;;  %1086 = vmatprep.subr.mxu1 %v488_v2  ;;  %v818_v1 = vld [vmem:[#allocation10] sm:$0xff]  ;;  %v865_v2 = vld [vmem:[#allocation10 + $0x178] sm:$0xff] }
 0x13e   :  { %1052 = vmatpush3.msra.mxu0 %v344_v3  ;;  %1087 = vmatpush3.msra.mxu1 %v440_v4  ;;  %v864_v3 = vld [vmem:[#allocation10 + $0x170] sm:$0xff]  ;;  %v863_v4 = vld [vmem:[#allocation10 + $0x168] sm:$0xff] }
 0x13f   :  { %1053 = vmatprep.subr.mxu0 %v389_v5  ;;  %1088 = vmatprep.subr.mxu1 %v485_v6  ;;  %v862_v5 = vld [vmem:[#allocation10 + $0x160] sm:$0xff]  ;;  %v861_v6 = vld [vmem:[#allocation10 + $0x158] sm:$0xff] }
 0x140   :  { %1054 = vmatpush3.msra.mxu0 %v341_v7  ;;  %1089 = vmatpush3.msra.mxu1 %v437_v11  ;;  %v860_v7 = vld [vmem:[#allocation10 + $0x150] sm:$0xff]  ;;  %v859_v11 = vld [vmem:[#allocation10 + $0x148] sm:$0xff] }
 0x141   :  { %1055 = vmatprep.subr.mxu0 %v386_v13  ;;  %1090 = vmatprep.subr.mxu1 %v482_v14  ;;  %v858_v13 = vld [vmem:[#allocation10 + $0x140] sm:$0xff]  ;;  %v857_v14 = vld [vmem:[#allocation10 + $0x138] sm:$0xff] }
 0x142   :  { %1056 = vmatpush3.msra.mxu0 %v338_v15  ;;  %1091 = vmatpush3.msra.mxu1 %v434_v16  ;;  %v856_v15 = vld [vmem:[#allocation10 + $0x130] sm:$0xff]  ;;  %v855_v16 = vld [vmem:[#allocation10 + $0x128] sm:$0xff] }
 0x143   :  { %1057 = vmatprep.subr.mxu0 %v383_v17  ;;  %1092 = vmatprep.subr.mxu1 %v479_v18  ;;  %v854_v17 = vld [vmem:[#allocation10 + $0x120] sm:$0xff]  ;;  %v853_v18 = vld [vmem:[#allocation10 + $0x118] sm:$0xff] }
 0x144   :  { %1058 = vmatpush3.msra.mxu0 %v335_v19  ;;  %1093 = vmatpush3.msra.mxu1 %v431_v22  ;;  %v852_v19 = vld [vmem:[#allocation10 + $0x110] sm:$0xff]  ;;  %v851_v22 = vld [vmem:[#allocation10 + $0x108] sm:$0xff] }
 0x145   :  { %1059 = vmatprep.subr.mxu0 %v380_v23  ;;  %1094 = vmatprep.subr.mxu1 %v476_v24  ;;  %v850_v23 = vld [vmem:[#allocation10 + $0x100] sm:$0xff]  ;;  %v516_v24 = vld [vmem:[%s1467_s4] sm:$0x7] }
 0x146   :  { %1060 = vmatpush3.msra.mxu0 %v332_v25  ;;  %1095 = vmatpush3.msra.mxu1 %v428_v27  ;;  %v521_v25 = vrot.slane %v516_v24, %v160_v10  ;;  %v525_v27 = vrot.slane %v516_v24, %v164_v12  ;;  %v529_v10 = vrot.slane %v516_v24, %v168_v9 }
 0x147   :  { %1061 = vmatprep.subr.mxu0 %v377_v28  ;;  %1096 = vmatprep.subr.mxu1 %v473_v30 }
 0x148   :  { %1062 = vmatpush3.msra.mxu0 %v329_v31  ;;  %1097 = vmatpush3.msra.mxu1 %v425_v32 }
 0x149   :  { %1063 = vmatprep.subr.mxu0 %v374_v33  ;;  %1098 = vmatprep.subr.mxu1 %v470_v34 }
 0x14a   :  { %1064 = vmatpush3.msra.mxu0 %v326_v35  ;;  %1099 = vmatpush3.msra.mxu1 %v422_v36 }
 0x14b   :  { %740 = vmatmul.mubr.f32.vlgmr.msra.gmra.mxu0 %v320_v29  ;;  %810 = vmatmul.mubr.f32.vlgmr.msra.gmra.mxu1 %v322_v26  ;;  %v828_v26 = vld [vmem:[#allocation10 + $0x50] sm:$0xff]  ;;  %v843_v29 = vld [vmem:[#allocation10 + $0xc8] sm:$0xff] }
 0x14c   :  { %1103 = vmatprep.subr.mxu0 %v849_v37  ;;  %1155 = vmatprep.subr.mxu1 %v1345_v0 }
 0x14d   :  { %1104 = vmatpush3.msra.mxu0 %v833_v38  ;;  %1156 = vmatpush3.msra.mxu1 %v865_v2 }
 0x14e   :  { %1105 = vmatprep.subr.mxu0 %v848_v39  ;;  %1157 = vmatprep.subr.mxu1 %v1345_v0 }
 0x14f   :  { %1106 = vmatpush3.msra.mxu0 %v832_v40  ;;  %1158 = vmatpush3.msra.mxu1 %v864_v3 }
 0x150   :  { %1107 = vmatprep.subr.mxu0 %v847_v41  ;;  %1159 = vmatprep.subr.mxu1 %v1345_v0 }
 0x151   :  { %1108 = vmatpush3.msra.mxu0 %v831_v42  ;;  %1160 = vmatpush3.msra.mxu1 %v863_v4 }
 0x152   :  { %1109 = vmatprep.subr.mxu0 %v846_v43  ;;  %1161 = vmatprep.subr.mxu1 %v1345_v0 }
 0x153   :  { %1110 = vmatpush3.msra.mxu0 %v830_v44  ;;  %1162 = vmatpush3.msra.mxu1 %v862_v5 }
 0x154   :  { %1111 = vmatprep.subr.mxu0 %v845_v45  ;;  %1163 = vmatprep.subr.mxu1 %v1345_v0 }
 0x155   :  { %1112 = vmatpush3.msra.mxu0 %v829_v21  ;;  %1164 = vmatpush3.msra.mxu1 %v861_v6 }
 0x156   :  { %1113 = vmatprep.subr.mxu0 %v844_v20  ;;  %1165 = vmatprep.subr.mxu1 %v1345_v0 }
 0x157   :  { %1114 = vmatpush3.msra.mxu0 %v828_v26  ;;  %1166 = vmatpush3.msra.mxu1 %v860_v7 }
 0x158   :  { %1115 = vmatprep.subr.mxu0 %v843_v29  ;;  %1167 = vmatprep.subr.mxu1 %v1345_v0  ;;  %v1032_v29 = vld [vmem:[%s1469_s6] ss:$0 sm:$0xff] }
 0x159   :  { %1116 = vmatpush3.msra.mxu0 %v827_v46  ;;  %1168 = vmatpush3.msra.mxu1 %v859_v11 }
 0x15a   :  { %1117 = vmatprep.subr.mxu0 %v842_v47  ;;  %1169 = vmatprep.subr.mxu1 %v1345_v0 }
 0x15b   :  { %1118 = vmatpush3.msra.mxu0 %v826_v48  ;;  %1170 = vmatpush3.msra.mxu1 %v858_v13 }
 0x15c   :  { %1119 = vmatprep.subr.mxu0 %v841_v49  ;;  %1171 = vmatprep.subr.mxu1 %v1345_v0 }
 0x15d   :  { %1120 = vmatpush3.msra.mxu0 %v825_v50  ;;  %1172 = vmatpush3.msra.mxu1 %v857_v14 }
 0x15e   :  { %1121 = vmatprep.subr.mxu0 %v840_v51  ;;  %1173 = vmatprep.subr.mxu1 %v1345_v0 }
 0x15f   :  { %1122 = vmatpush3.msra.mxu0 %v824_v52  ;;  %1174 = vmatpush3.msra.mxu1 %v856_v15 }
 0x160   :  { %1123 = vmatprep.subr.mxu0 %v839_v53  ;;  %1175 = vmatprep.subr.mxu1 %v1345_v0 }
 0x161   :  { %1124 = vmatpush3.msra.mxu0 %v823_v54  ;;  %1176 = vmatpush3.msra.mxu1 %v855_v16 }
 0x162   :  { %1125 = vmatprep.subr.mxu0 %v838_v55  ;;  %1177 = vmatprep.subr.mxu1 %v1345_v0 }
 0x163   :  { %1126 = vmatpush3.msra.mxu0 %v822_v56  ;;  %1178 = vmatpush3.msra.mxu1 %v854_v17 }
 0x164   :  { %1127 = vmatprep.subr.mxu0 %v837_v57  ;;  %1179 = vmatprep.subr.mxu1 %v1345_v0 }
 0x165   :  { %1128 = vmatpush3.msra.mxu0 %v821_v58  ;;  %1180 = vmatpush3.msra.mxu1 %v853_v18 }
 0x166   :  { %1129 = vmatprep.subr.mxu0 %v836_v59  ;;  %1181 = vmatprep.subr.mxu1 %v1345_v0 }
 0x167   :  { %1130 = vmatpush3.msra.mxu0 %v820_v60  ;;  %1182 = vmatpush3.msra.mxu1 %v852_v19 }
 0x168   :  { %1131 = vmatprep.subr.mxu0 %v835_v61  ;;  %1183 = vmatprep.subr.mxu1 %v1345_v0 }
 0x169   :  { %1132 = vmatpush3.msra.mxu0 %v819_v62  ;;  %1184 = vmatpush3.msra.mxu1 %v851_v22 }
 0x16a   :  { %1133 = vmatprep.subr.mxu0 %v834_v63  ;;  %1185 = vmatprep.subr.mxu1 %v1345_v0 }
 0x16b   :  { %1134 = vmatpush3.msra.mxu0 %v818_v1  ;;  %1186 = vmatpush3.msra.mxu1 %v850_v23 }
 0x16c   :  { %1187 = vmatprep.mubr.msk.f32.mxu1 %vm1346_vm0, %v1345_v0 }
 0x1ea   :  { %v599_v28 = vpop.f32.mrf.mxu0  ;;  %v670_v30 = vpop.f32.mrf.mxu1 }
 0x1eb   :  { %v600_v31 = vadd.f32 %v599_v28, %v521_v25 }
 0x1ec   :  { %v601_v32 = vpop.f32.mrf.mxu0  ;;  %v672_v35 = vpop.f32.mrf.mxu1 }
 0x1ed   :  { %v602_v33 = vadd.f32 %v601_v32, %v525_v27  ;;  %v671_v34 = vadd.f32 %v670_v30, %v600_v31 }
 0x1ef   :  { %v673_v36 = vadd.f32 %v672_v35, %v602_v33  ;;  %v815_v0 = vmax.f32 %v671_v34, 0.0 }
 0x1f1   :  { %v816_v37 = vmax.f32 %v673_v36, 0.0 }
 0x1f3   :  { %937 = vmatprep.mubr.f32.mxu0 %v816_v37 }
 0x1f4   :  { %938 = vmatmul.mubr.f32.vlgmr.msra.gmra.mxu0 %v815_v0 }
 0x20b   :  { %v1065_v38 = vpop.f32.mrf.mxu0  ;;  %v1100_v39 = vpop.f32.mrf.mxu1 }
 0x20d   :  { %v1066_v40 = vpop.f32.mrf.mxu0  ;;  %v1101_v41 = vpop.f32.mrf.mxu1 }
 0x20e   :  { %v1067_v12 = vadd.f32 %v1066_v40, %v1065_v38  ;;  %v1102_v43 = vadd.f32 %v1101_v41, %v1100_v39 }
 0x210   :  { %v742_v42 = vadd.f32 %v1067_v12, %v529_v10 }
 0x212   :  { %v812_v44 = vadd.f32 %v1102_v43, %v742_v42 }
 0x214   :  { %v817_v45 = vmax.f32 %v812_v44, 0.0 }
 0x216   :  { %1188 = vmatmul.mubr.f32.vlgmr.msra.gmra.mxu1 %v817_v45 }
 0x2b4   :  { %v1135_v21 = vpop.f32.mrf.mxu0 }
 0x2b6   :  { %v1136_v20 = vpop.f32.mrf.mxu0 }
 0x2b7   :  { %v1137_v26 = vadd.f32 %v1136_v20, %v1135_v21 }
 0x2b9   :  { %v940_v46 = vadd.f32 %v1137_v26, %v1032_v29 }
 0x2d6   :  { %v1009_v47 = vpop.f32.mrf.mxu1 }
 0x2d7   :  { %v1010_v48 = vadd.f32 %v1009_v47, %v940_v46 }
 0x2d8   :  { %v1189_v8 = vpop.f32.mrf.mxu1 }
 0x2d9   :  { %1204 = vtanh.f32 %v1010_v48 }
 0x2e6   :  { %v1205_v9 = vpop.eup %1204 }
 0x2e7   :  { %1014 = vst [vmem:[#allocation11] sm:$0xff] %v1205_v9 }
 0x2e8   :  { %1317 = shalt.err (!%p1314_p1)
}
 0x2e9   :  { %1024 = dma.vmem_to_hbm [thread:$0]  %s1022_s8, 128, %s1470_s7, [#allocation4]  }
 0x2ea   :  { %1332 = dma.done.wait [#allocation4], 128  }
 0x2eb   :  { %1333 = vsyncadd [#allocation4], 4294967168 }
 0x2ec   :  { %1028 = vsyncpa [#allocation3], 1 }
 0x2ed   :  { %1029 = vsyncpa [#allocation6], 1 }
 0x2ee   :  { %1030 = vsyncpa [#allocation9], 1 }
 0x2ef   :  { %1031 = vsyncpa [#allocation4], 1 }

</bundles_post_ra>
